<compile_context>
chip_gen: v5e
topology: v5e:2x2
jax: 0.10.0
libtpu: 0.0.40
codegen_flags: <defaults>
</compile_context>

<pallas_src>
import jax
import jax.numpy as jnp
from jax.experimental import pallas as pl
from jax.experimental.pallas import tpu as pltpu


def _round_up(x, m):
    return (x + m - 1) // m * m


def _mlp_kernel(x_ref, w1_ref, b1_ref, w2_ref, b2_ref, w3_ref, b3_ref, o_ref):
    # fc1 + relu  (MXU matmul, f32 accumulation; operands may be bf16)
    h1 = jnp.dot(x_ref[...], w1_ref[...], preferred_element_type=jnp.float32) + b1_ref[...]
    h1 = jnp.maximum(h1, 0.0)

    # fc2 + relu  (hidden padded to 128 lanes; zero columns stay zero through relu)
    h2 = jnp.dot(h1.astype(w2_ref.dtype), w2_ref[...],
                 preferred_element_type=jnp.float32) + b2_ref[...]
    h2 = jnp.maximum(h2, 0.0)

    # fc3 (out width 1): VPU multiply + XLU lane reduction keeps the MXU free and lets us
    # store the result lane-dense as a (1, 1, tb) row instead of a masked (tb, 1) column.
    z = jnp.sum(h2 * w3_ref[...], axis=-1) + b3_ref[0, 0]          # (tb,)
    o_ref[...] = jax.nn.sigmoid(z)[None, None, :].astype(o_ref.dtype)


def nn_forward(x, params, *, batch_tile=None, matmul_dtype=jnp.bfloat16):
    """x: (B, input_size) float32.  params: dict w1,b1,w2,b2,w3,b3 (x @ W + b layout)."""
    x = jnp.asarray(x, jnp.float32)
    B, D = x.shape

    w1, b1 = params["w1"], params["b1"]          # (D, 128), (1, 128)
    w2, b2 = params["w2"], params["b2"]          # (128, 64), (1, 64)
    w3, b3 = params["w3"], params["b3"]          # (64, 1),  (1, 1)
    H1 = w1.shape[1]
    H2 = w2.shape[1]
    H2P = _round_up(H2, 128)                     # pad middle layer to full lane width

    # Zero-pad hidden 64 -> 128: relu(0)=0 and zero w3 rows keep the math identical.
    w2p = jnp.zeros((H1, H2P), jnp.float32).at[:, :H2].set(w2.astype(jnp.float32))
    b2p = jnp.zeros((1, H2P), jnp.float32).at[:, :H2].set(b2.astype(jnp.float32))
    w3row = jnp.zeros((1, H2P), jnp.float32).at[0, :H2].set(w3[:, 0].astype(jnp.float32))
    b1f = b1.astype(jnp.float32)
    b3f = b3.astype(jnp.float32).reshape(1, 1)

    # Matmul operands in matmul_dtype; activation/bias/sigmoid math stays f32.
    xc = x.astype(matmul_dtype)
    w1c = w1.astype(matmul_dtype)
    w2c = w2p.astype(matmul_dtype)

    # Batch tiling: real tile (not "whole batch") so the grid actually pipelines and bounds the
    # VMEM working set; tile is a multiple of 8 to satisfy the (8,128) constraint.
    if batch_tile is None:
        tb = 2048 if B >= 2048 else _round_up(B, 8)
    else:
        tb = max(8, _round_up(int(batch_tile), 8))
    Bp = _round_up(B, tb)
    if Bp != B:
        xc = jnp.pad(xc, ((0, Bp - B), (0, 0)))
    grid_b = Bp // tb

    full = lambda a: pl.BlockSpec(a.shape, lambda i: (0, 0))  # VMEM-resident full tensor

    flops = 2 * Bp * (D * H1 + H1 * H2P + H2P)
    bytes_accessed = sum(int(a.size * a.dtype.itemsize)
                         for a in (xc, w1c, b1f, w2c, b2p, w3row, b3f)) + Bp * 4

    out = pl.pallas_call(
        _mlp_kernel,
        out_shape=jax.ShapeDtypeStruct((grid_b, 1, tb), jnp.float32),
        grid_spec=pltpu.PrefetchScalarGridSpec(
            num_scalar_prefetch=0,
            grid=(grid_b,),
            in_specs=[
                pl.BlockSpec((tb, D), lambda i: (i, 0)),             # x tile over batch
                full(w1c), full(b1f),
                full(w2c), full(b2p),
                full(w3row),
                pl.BlockSpec(memory_space=pltpu.MemorySpace.SMEM),   # b3 scalar in SMEM
            ],
            out_specs=pl.BlockSpec((1, 1, tb), lambda i: (i, 0, 0)),  # lane-dense output row
        ),
        compiler_params=pltpu.CompilerParams(
            dimension_semantics=("parallel",),        # batch steps independent (v7x 2-TC shard)
            vmem_limit_bytes=32 * 1024 * 1024,        # safe on v5e/v6e (128 MiB) and v7x (64 MiB)
        ),
        cost_estimate=pl.CostEstimate(
            flops=int(flops),
            transcendentals=int(Bp),
            bytes_accessed=int(bytes_accessed),
        ),
    )(xc, w1c, b1f, w2c, b2p, w3row, b3f)

    # (grid_b, 1, tb) lane-dense tiles -> (B, 1), dropping batch padding.
    return out.reshape(Bp)[:B][:, None]


def init_params(key, input_size):
    """Deterministic init mirroring PyTorch nn.Linear default (U[-1/sqrt(fan_in), 1/sqrt(fan_in)])."""
    def linear(k, fan_in, fan_out):
        kw, kb = jax.random.split(k)
        bound = 1.0 / jnp.sqrt(fan_in)
        w = jax.random.uniform(kw, (fan_in, fan_out), jnp.float32, -bound, bound)
        b = jax.random.uniform(kb, (1, fan_out), jnp.float32, -bound, bound)
        return w, b

    k1, k2, k3 = jax.random.split(key, 3)
    w1, b1 = linear(k1, input_size, 128)
    w2, b2 = linear(k2, 128, 64)
    w3, b3 = linear(k3, 64, 1)
    return {"w1": w1, "b1": b1, "w2": w2, "b2": b2, "w3": w3, "b3": b3}


def nn_forward_ref(x, p):
    h1 = jnp.maximum(x @ p["w1"] + p["b1"], 0.0)
    h2 = jnp.maximum(h1 @ p["w2"] + p["b2"], 0.0)
    return jax.nn.sigmoid(h2 @ p["w3"] + p["b3"])


if __name__ == "__main__":
    key = jax.random.PRNGKey(0)
    kx, kp, kx2 = jax.random.split(key, 3)

    INPUT_SIZE = 32
    params = init_params(kp, INPUT_SIZE)

    # 1) Small exact check: f32 matmul operands, single grid step.
    B = 8
    x = jax.random.normal(kx, (B, INPUT_SIZE), dtype=jnp.float32)
    out = jax.block_until_ready(nn_forward(x, params, matmul_dtype=jnp.float32))
    ref = nn_forward_ref(x, params)
    assert out.shape == (B, 1)
    assert jnp.allclose(out, ref, atol=5e-5, rtol=5e-5), "f32 mismatch vs pure-JAX reference"

    # 2) Multi-tile check: grid > 1, batch padding (200 -> 256), default bf16 matmul operands.
    B2 = 200
    x2 = jax.random.normal(kx2, (B2, INPUT_SIZE), dtype=jnp.float32)
    out2 = jax.block_until_ready(nn_forward(x2, params, batch_tile=128))
    ref2 = nn_forward_ref(x2, params)
    assert out2.shape == (B2, 1)
    assert jnp.allclose(out2, ref2, atol=3e-2, rtol=3e-2), "bf16 mismatch vs pure-JAX reference"

    print("KERNEL_OK")
</pallas_src>

<mosaic_0001>
module attributes {stable_mosaic.version = 11 : i64} {
  func.func @_mlp_kernel(%arg0: i32, %arg1: memref<8x32xf32, #tpu.memory_space<vmem>>, %arg2: memref<32x128xf32, #tpu.memory_space<vmem>>, %arg3: memref<1x128xf32, #tpu.memory_space<vmem>>, %arg4: memref<128x128xf32, #tpu.memory_space<vmem>>, %arg5: memref<1x128xf32, #tpu.memory_space<vmem>>, %arg6: memref<1x128xf32, #tpu.memory_space<vmem>>, %arg7: memref<1x1xf32, #tpu.memory_space<smem>>, %arg8: memref<1x1x8xf32, #tpu.memory_space<vmem>>) attributes {dimension_semantics = [#tpu.dimension_semantics<parallel>], iteration_bounds = array<i64: 1>, scalar_prefetch = 0 : i64, scratch_operands = 0 : i64, tpu.core_type = #tpu.core_type<tc>, window_params = [{transform_indices = @transform_0, window_bounds = array<i64: 8, 32>}, {pipeline_mode = #tpu.pipeline_mode<synchronous>, transform_indices = @transform_1, window_bounds = array<i64: 32, 128>}, {pipeline_mode = #tpu.pipeline_mode<synchronous>, transform_indices = @transform_2, window_bounds = array<i64: 1, 128>}, {pipeline_mode = #tpu.pipeline_mode<synchronous>, transform_indices = @transform_3, window_bounds = array<i64: 128, 128>}, {pipeline_mode = #tpu.pipeline_mode<synchronous>, transform_indices = @transform_4, window_bounds = array<i64: 1, 128>}, {pipeline_mode = #tpu.pipeline_mode<synchronous>, transform_indices = @transform_5, window_bounds = array<i64: 1, 128>}, {transform_indices = @transform_6, window_bounds = array<i64: 1, 1>}, {transform_indices = @transform_7, window_bounds = array<i64: 1, 1, 8>}]} {
    %c0 = arith.constant 0 : index
    %c0_0 = arith.constant 0 : index
    %0 = vector.load %arg1[%c0, %c0_0] : memref<8x32xf32, #tpu.memory_space<vmem>>, vector<8x32xf32>
    %c0_1 = arith.constant 0 : index
    %c0_2 = arith.constant 0 : index
    %1 = vector.load %arg2[%c0_1, %c0_2] : memref<32x128xf32, #tpu.memory_space<vmem>>, vector<32x128xf32>
    %cst = arith.constant dense<0.000000e+00> : vector<8x128xf32>
    %2 = tpu.matmul %0, %1, %cst {dimension_numbers = #tpu.dot_dimension_numbers<[1], [0], [0], [1], [0, 0, 1, 1], [], []>} : vector<8x32xf32>, vector<32x128xf32>, vector<8x128xf32> -> vector<8x128xf32>
    %c0_3 = arith.constant 0 : index
    %c0_4 = arith.constant 0 : index
    %3 = vector.load %arg3[%c0_3, %c0_4] : memref<1x128xf32, #tpu.memory_space<vmem>>, vector<1x128xf32>
    %4 = vector.broadcast %3 : vector<1x128xf32> to vector<8x128xf32>
    %5 = arith.addf %2, %4 : vector<8x128xf32>
    %cst_5 = arith.constant 0.000000e+00 : f32
    %6 = vector.broadcast %cst_5 : f32 to vector<8x128xf32>
    %7 = arith.maximumf %5, %6 : vector<8x128xf32>
    %c0_6 = arith.constant 0 : index
    %c0_7 = arith.constant 0 : index
    %8 = vector.load %arg4[%c0_6, %c0_7] : memref<128x128xf32, #tpu.memory_space<vmem>>, vector<128x128xf32>
    %cst_8 = arith.constant dense<0.000000e+00> : vector<8x128xf32>
    %9 = tpu.matmul %7, %8, %cst_8 {dimension_numbers = #tpu.dot_dimension_numbers<[1], [0], [0], [1], [0, 0, 1, 1], [], []>} : vector<8x128xf32>, vector<128x128xf32>, vector<8x128xf32> -> vector<8x128xf32>
    %c0_9 = arith.constant 0 : index
    %c0_10 = arith.constant 0 : index
    %10 = vector.load %arg5[%c0_9, %c0_10] : memref<1x128xf32, #tpu.memory_space<vmem>>, vector<1x128xf32>
    %11 = vector.broadcast %10 : vector<1x128xf32> to vector<8x128xf32>
    %12 = arith.addf %9, %11 : vector<8x128xf32>
    %cst_11 = arith.constant 0.000000e+00 : f32
    %13 = vector.broadcast %cst_11 : f32 to vector<8x128xf32>
    %14 = arith.maximumf %12, %13 : vector<8x128xf32>
    %c0_12 = arith.constant 0 : index
    %c0_13 = arith.constant 0 : index
    %15 = vector.load %arg6[%c0_12, %c0_13] : memref<1x128xf32, #tpu.memory_space<vmem>>, vector<1x128xf32>
    %16 = vector.broadcast %15 : vector<1x128xf32> to vector<8x128xf32>
    %17 = arith.mulf %14, %16 : vector<8x128xf32>
    %cst_14 = arith.constant dense<0.000000e+00> : vector<8xf32>
    %18 = vector.multi_reduction <add>, %17, %cst_14 [1] : vector<8x128xf32> to vector<8xf32>
    %c0_15 = arith.constant 0 : index
    %c0_16 = arith.constant 0 : index
    %19 = memref.load %arg7[%c0_15, %c0_16] : memref<1x1xf32, #tpu.memory_space<smem>>
    %20 = vector.broadcast %19 : f32 to vector<8xf32>
    %21 = arith.addf %18, %20 : vector<8xf32>
    %22 = arith.negf %21 : vector<8xf32>
    %23 = math.exp %22 : vector<8xf32>
    %cst_17 = arith.constant 1.000000e+00 : f32
    %24 = vector.broadcast %cst_17 : f32 to vector<8xf32>
    %25 = arith.addf %24, %23 : vector<8xf32>
    %26 = arith.divf %24, %25 : vector<8xf32>
    %27 = vector.shape_cast %26 : vector<8xf32> to vector<1x1x8xf32>
    %c0_18 = arith.constant 0 : index
    %c0_19 = arith.constant 0 : index
    %c0_20 = arith.constant 0 : index
    %28 = vector.load %arg8[%c0_18, %c0_19, %c0_20] : memref<1x1x8xf32, #tpu.memory_space<vmem>>, vector<1x1x8xf32>
    tpu.vector_store %arg8[%c0_18, %c0_19, %c0_20], %27 {strides = array<i32>} : memref<1x1x8xf32, #tpu.memory_space<vmem>>, vector<1x1x8xf32>,
    return
  }
  func.func @transform_0(%arg0: i32) -> (i32, i32) {
    %c0_i32 = arith.constant 0 : i32
    %c0_i32_0 = arith.constant 0 : i32
    return %arg0, %c0_i32 : i32, i32
  }
  func.func @transform_1(%arg0: i32) -> (i32, i32) {
    %c0_i32 = arith.constant 0 : i32
    %c0_i32_0 = arith.constant 0 : i32
    %c0_i32_1 = arith.constant 0 : i32
    return %c0_i32, %c0_i32_0 : i32, i32
  }
  func.func @transform_2(%arg0: i32) -> (i32, i32) {
    %c0_i32 = arith.constant 0 : i32
    %c0_i32_0 = arith.constant 0 : i32
    %c0_i32_1 = arith.constant 0 : i32
    return %c0_i32, %c0_i32_0 : i32, i32
  }
  func.func @transform_3(%arg0: i32) -> (i32, i32) {
    %c0_i32 = arith.constant 0 : i32
    %c0_i32_0 = arith.constant 0 : i32
    %c0_i32_1 = arith.constant 0 : i32
    return %c0_i32, %c0_i32_0 : i32, i32
  }
  func.func @transform_4(%arg0: i32) -> (i32, i32) {
    %c0_i32 = arith.constant 0 : i32
    %c0_i32_0 = arith.constant 0 : i32
    %c0_i32_1 = arith.constant 0 : i32
    return %c0_i32, %c0_i32_0 : i32, i32
  }
  func.func @transform_5(%arg0: i32) -> (i32, i32) {
    %c0_i32 = arith.constant 0 : i32
    %c0_i32_0 = arith.constant 0 : i32
    %c0_i32_1 = arith.constant 0 : i32
    return %c0_i32, %c0_i32_0 : i32, i32
  }
  func.func @transform_6(%arg0: i32) -> (i32, i32) {
    %c0_i32 = arith.constant 0 : i32
    %c0_i32_0 = arith.constant 0 : i32
    %c0_i32_1 = arith.constant 0 : i32
    return %c0_i32, %c0_i32_0 : i32, i32
  }
  func.func @transform_7(%arg0: i32) -> (i32, i32, i32) {
    %c0_i32 = arith.constant 0 : i32
    %c0_i32_0 = arith.constant 0 : i32
    %c0_i32_1 = arith.constant 0 : i32
    return %arg0, %c0_i32, %c0_i32_0 : i32, i32, i32
  }
}

</mosaic_0001>

<bundles_post_ra>
// kernel: tpu_custom_call.1
= control target key start
LH: loop header
LB: loop body
LE: loop exit
PB: predicated region body
PF: predicated region fallthrough
CT: control target
= control target key end

     0   :  { %13 = vsyncpa [#allocation4], 0  ;;  %s389_s0 = inlined_call_operand.hbm [shape: f32[8,32], index: 0, kind: input, shape index: {}]   ;;  %s390_s1 = inlined_call_operand.hbm [shape: f32[32,128], index: 1, kind: input, shape index: {}]   ;;  %s391_s2 = inlined_call_operand.vmem [shape: f32[1,128], index: 2, kind: input, shape index: {}]   ;;  %s392_s3 = inlined_call_operand.hbm [shape: f32[128,128], index: 3, kind: input, shape index: {}]   ;;  %s393_s4 = inlined_call_operand.vmem [shape: f32[1,128], index: 4, kind: input, shape index: {}]   ;;  %s394_s5 = inlined_call_operand.vmem [shape: f32[1,128], index: 5, kind: input, shape index: {}]   ;;  %s395_s6 = inlined_call_operand.<no memory space> [shape: f32[1,1], index: 6, kind: input, shape index: {}]   ;;  %s396_s7 = inlined_call_operand.hbm [shape: f32[1,1,8], index: 7, kind: output, shape index: {}]  }
   0x1   :  { %14 = vsyncpa [#allocation7], 0  ;;  %s31_s26 = sshll.u32 %s390_s1, 4  ;;  %s32_s26 = int_to_ptr.hbm [resolvable:$true] %s31_s26 }
   0x2   :  { %15 = vsyncpa [#allocation5], 0  ;;  %s319_s27 = smov [#allocation6]   ;;  %s21_s8 = sshll.u32 %s389_s0, 4  ;;  %s22_s8 = int_to_ptr.hbm [resolvable:$true] %s21_s8 }
   0x3   :  { %s33_s28 = sshll.u32 %s319_s27, 4  ;;  %s320_s9 = smov 128   ;;  %s34_s28 = int_to_ptr.vmem [resolvable:$true] %s33_s28 }
   0x4   :  { %s321_s10 = smov 8   ;;  %s322_s11 = smov [#allocation3]  }
   0x5   :  { %39 = dma.hbm_to_vmem [thread:$0]  %s32_s26, 512, %s34_s28, [#allocation7], %s320_s9, %s320_s9, %s321_s10  }
   0x6   :  { %s23_s12 = sshll.u32 %s322_s11, 4  ;;  %s46_s15 = sshll.u32 %s392_s3, 4  ;;  %s24_s12 = int_to_ptr.vmem [resolvable:$true] %s23_s12  ;;  %s47_s15 = int_to_ptr.hbm [resolvable:$true] %s46_s15 }
   0x7   :  { %26 = dma.hbm_to_vmem [thread:$0]  %s22_s8, 128, %s24_s12, [#allocation4]  }
   0x8   :  { %s323_s1 = smov [#allocation8]  }
   0x9   :  { %s48_s16 = sshll.u32 %s323_s1, 4  ;;  %s49_s16 = int_to_ptr.vmem [resolvable:$true] %s48_s16 }
   0xa   :  { %54 = dma.hbm_to_vmem [thread:$0]  %s47_s15, 2048, %s49_s16, [#allocation7], %s320_s9, %s320_s9, %s321_s10  }
   0xb   :  { %313 = dma.done.wait [#allocation4], 128  }
   0xc   :  { %314 = vsyncadd [#allocation4], 4294967168 }
   0xd   :  { %315 = dma.done.wait [#allocation7], 2560  }
   0xe   :  { %316 = vsyncadd [#allocation7], 4294964736  ;;  %v77_v0 = vld [vmem:[#allocation6 + $0x18] sm:$0xff]  ;;  %v76_v1 = vld [vmem:[#allocation6 + $0x10] sm:$0xff]  ;;  %vm82_vm0 = vcmask 261120   ;;  %v156_v31 = vstv %s395_s6  ;;  %v178_v40 = vlaneseq  ;;  %s191_s23 = sshll.u32 %s396_s7, 4  ;;  %s192_s23 = int_to_ptr.hbm [resolvable:$true] %s191_s23 }
   0xf   :  { %98 = vmatpush.msra.mxu0 %v77_v0  ;;  %v122_v2 = vld [vmem:[#allocation8 + $0x78] sm:$0xff]  ;;  %v75_v3 = vld [vmem:[#allocation6 + $0x8] sm:$0xff]  ;;  %v121_v4 = vld [vmem:[#allocation8 + $0x70] sm:$0xff]  ;;  %vm182_vm5 = vcmask 57344  }
  0x10   :  { %127 = vmatpush.msra.mxu1 %v122_v2  ;;  %v120_v5 = vld [vmem:[#allocation8 + $0x68] sm:$0xff]  ;;  %v74_v6 = vld [vmem:[#allocation6] sm:$0xff]  ;;  %v73_v7 = vld [vmem:[#allocation3] sm:$0xff]  ;;  %v179_v45 = vand.u32 127, %v178_v40 }
  0x11   :  { %99 = vmatpush.msra.mxu0 %v76_v1  ;;  %v119_v8 = vld [vmem:[#allocation8 + $0x60] sm:$0xff]  ;;  %v118_v9 = vld [vmem:[#allocation8 + $0x58] sm:$0xff]  ;;  %v117_v10 = vld [vmem:[#allocation8 + $0x50] sm:$0xff] }
  0x12   :  { %128 = vmatpush.msra.mxu1 %v121_v4  ;;  %v116_v11 = vld [vmem:[#allocation8 + $0x48] sm:$0xff]  ;;  %v115_v12 = vld [vmem:[#allocation8 + $0x40] sm:$0xff]  ;;  %v114_v13 = vld [vmem:[#allocation8 + $0x38] sm:$0xff] }
  0x13   :  { %100 = vmatpush.msra.mxu0 %v75_v3  ;;  %v113_v14 = vld [vmem:[#allocation8 + $0x30] sm:$0xff]  ;;  %v112_v15 = vld [vmem:[#allocation8 + $0x28] sm:$0xff]  ;;  %v111_v16 = vld [vmem:[#allocation8 + $0x20] sm:$0xff] }
  0x14   :  { %129 = vmatpush.msra.mxu1 %v120_v5  ;;  %v110_v17 = vld [vmem:[#allocation8 + $0x18] sm:$0xff]  ;;  %v109_v18 = vld [vmem:[#allocation8 + $0x10] sm:$0xff]  ;;  %v108_v19 = vld [vmem:[#allocation8 + $0x8] sm:$0xff] }
  0x15   :  { %101 = vmatpush.msra.mxu0 %v74_v6  ;;  %v107_v20 = vld [vmem:[#allocation8] sm:$0xff]  ;;  %v210_v21 = vld [vmem:[%s391_s2] ss:$0 sm:$0xff]  ;;  %s324_s2 = smov [#allocation9]  }
  0x16   :  { %202 = vmatmul.msk.f32.vlgmr.msra.gmra.mxu0 %vm82_vm0, %v73_v7  ;;  %130 = vmatpush.msra.mxu1 %v119_v8  ;;  %v211_v25 = vld [vmem:[%s393_s4] ss:$0 sm:$0xff]  ;;  %s189_s4 = sshll.u32 %s324_s2, 4  ;;  %s190_s4 = int_to_ptr.vmem [resolvable:$true] %s189_s4 }
  0x17   :  { %v212_v28 = vld [vmem:[%s394_s5] ss:$0 sm:$0xff] }
  0x18   :  { %131 = vmatpush.msra.mxu1 %v118_v9 }
  0x1a   :  { %132 = vmatpush.msra.mxu1 %v117_v10 }
  0x1c   :  { %133 = vmatpush.msra.mxu1 %v116_v11 }
  0x1e   :  { %134 = vmatpush.msra.mxu1 %v115_v12 }
  0x20   :  { %135 = vmatpush.msra.mxu1 %v114_v13 }
  0x22   :  { %136 = vmatpush.msra.mxu1 %v113_v14 }
  0x24   :  { %137 = vmatpush.msra.mxu1 %v112_v15 }
  0x26   :  { %138 = vmatpush.msra.mxu1 %v111_v16 }
  0x28   :  { %139 = vmatpush.msra.mxu1 %v110_v17 }
  0x2a   :  { %140 = vmatpush.msra.mxu1 %v109_v18 }
  0x2c   :  { %141 = vmatpush.msra.mxu1 %v108_v19 }
  0x2e   :  { %142 = vmatpush.msra.mxu1 %v107_v20 }
  0x93   :  { %v103_v22 = vpop.f32.mrf.mxu0 }
  0x94   :  { %v104_v23 = vadd.f32 %v210_v21, %v103_v22 }
  0x96   :  { %v106_v24 = vmax.f32 %v104_v23, 0.0 }
  0x98   :  { %143 = vmatmul.f32.vlgmr.msra.gmra.mxu1 %v106_v24 }
 0x115   :  { %v144_v26 = vpop.f32.mrf.mxu1 }
 0x116   :  { %v145_v27 = vadd.f32 %v211_v25, %v144_v26 }
 0x118   :  { %v147_v29 = vmax.f32 %v145_v27, 0.0 }
 0x11a   :  { %v152_v30 = vmul.f32 %v212_v28, %v147_v29 }
 0x11c   :  { %153 = vadd.xlane.f32.xlu0 %v152_v30 }
 0x18f   :  { %v154_v32 = vpop.xlane.xlu0 %153 }
 0x190   :  { %v157_v33 = vadd.f32 %v156_v31, %v154_v32 }
 0x192   :  { %v203_v34 = vmul.f32 -1.442695, %v157_v33 }
 0x194   :  { %213 = vpow2.f32 %v203_v34 }
 0x19a   :  { %v214_v35 = vpop.eup %213 }
 0x19b   :  { %v161_v36 = vadd.f32 1.0, %v214_v35 }
 0x19d   :  { %215 = vrcp.f32 %v161_v36  ;;  %v173_v41 = vand.u32 2147483648, %v161_v36  ;;  %v171_v43 = vand.u32 2147483647, %v161_v36  ;;  %vm167_vm2 = vweird.f32 %v161_v36 }
 0x19f   :  { %v174_v46 = vor.u32 1.1754944e-38, %v173_v41  ;;  %vm172_vm4 = vcmp.eq.f32.partialorder %v171_v43, 8.507059e+37 }
 0x1a3   :  { %v216_v37 = vpop.eup %215 }
 0x1a4   :  { %v163_v38 = vmul.f32 %v216_v37, %v161_v36  ;;  %vm168_vm1 = vweird.f32 %v216_v37 }
 0x1a5   :  { %vm169_vm3 = vmor %vm167_vm2, %vm168_vm1 }
 0x1a6   :  { %v164_v39 = vsub.f32 1.0, %v163_v38 }
 0x1a8   :  { %v165_v42 = vmul.f32 %v216_v37, %v164_v39 }
 0x1aa   :  { %v166_v44 = vadd.f32 %v216_v37, %v165_v42 }
 0x1ac   :  { %v170_v47 = vsel %vm169_vm3, %v216_v37, %v166_v44 }
 0x1ad   :  { %v175_v48 = vsel %vm172_vm4, %v174_v46, %v170_v47 }
 0x1ae   :  { %v180_v49 = vperm.slane %v175_v48, %v179_v45 }
 0x1b0   :  { %183 = vst.msk [vmem:[#allocation9] sm:$0x1] %vm182_vm5, %v180_v49 }
 0x1b1   :  { %194 = dma.vmem_to_hbm [thread:$0]  %s190_s4, 16, %s192_s23, [#allocation5]  }
 0x1b2   :  { %317 = dma.done.wait [#allocation5], 16  }
 0x1b3   :  { %318 = vsyncadd [#allocation5], 4294967280 }
 0x1b4   :  { %199 = vsyncpa [#allocation4], 1 }
 0x1b5   :  { %200 = vsyncpa [#allocation7], 1 }
 0x1b6   :  { %201 = vsyncpa [#allocation5], 1 }

</bundles_post_ra>
